<compile_context>
chip_gen: v6e
topology: v6e:2x2x1
jax: 0.10.0
libtpu: 0.0.40
codegen_flags: <defaults>
</compile_context>

<pallas_src>
import jax
import jax.numpy as jnp
from math import sqrt
from jax.experimental import pallas as pl
from jax.experimental.pallas import tpu as pltpu


def _round_up(x, m):
    return ((x + m - 1) // m) * m


def critic_kernel(s_ref, a_ref, w1s_ref, w1a_ref, b1_ref,
                  w2_ref, b2_ref, w3_ref, b3_ref, o_ref):
    wdt = w1s_ref.dtype  # narrow MXU input dtype (bf16 by default)

    # fc1: split matmul == matmul of cat([s, a], dim=1) against the full W1.
    h1 = (jnp.dot(s_ref[...].astype(wdt), w1s_ref[...],
                  preferred_element_type=jnp.float32)
          + jnp.dot(a_ref[...].astype(wdt), w1a_ref[...],
                    preferred_element_type=jnp.float32)
          + b1_ref[...])                      # bias kept f32
    h1 = jnp.maximum(h1, 0.0)                 # ReLU in f32 (VPU)

    # fc2
    h2 = jnp.dot(h1.astype(wdt), w2_ref[...],
                 preferred_element_type=jnp.float32) + b2_ref[...]
    h2 = jnp.maximum(h2, 0.0)

    # q_value (H -> 1): VPU multiply + cross-lane reduce instead of an N=1
    # MXU matmul (MXU would pad the result tile out to 128 lanes).
    q = jnp.sum(h2 * w3_ref[...].astype(jnp.float32), axis=-1, keepdims=True)
    q = q + b3_ref[...]
    o_ref[...] = q.astype(o_ref.dtype)


def critic_forward(s, a, params, *, block_b=512):
    """s: (B, input_dim) f32, a: (B, action_dim) f32 -> (B, 1) f32."""
    w1s, w1a, b1, w2, b2, w3, b3 = params
    B, input_dim = s.shape
    action_dim = a.shape[1]
    H = w2.shape[0]

    # Batch tile: multiple of 8 sublanes; pad B so the grid divides evenly.
    tb = min(block_b, _round_up(B, 8))
    B_pad = _round_up(B, tb)
    if B_pad != B:
        s = jnp.pad(s, ((0, B_pad - B), (0, 0)))
        a = jnp.pad(a, ((0, B_pad - B), (0, 0)))

    grid = (B_pad // tb,)

    def act_spec(feat):
        return pl.BlockSpec((tb, feat), lambda i: (i, 0))

    def fixed_spec(shape):
        return pl.BlockSpec(shape, lambda i: (0, 0))   # resident in VMEM

    flops = 2 * B_pad * ((input_dim + action_dim) * H + H * H + H)
    bytes_accessed = int(
        s.size * s.dtype.itemsize + a.size * a.dtype.itemsize
        + sum(int(p.size) * p.dtype.itemsize for p in params)
        + B_pad * 4)

    out = pl.pallas_call(
        critic_kernel,
        out_shape=jax.ShapeDtypeStruct((B_pad, 1), jnp.float32),
        grid=grid,
        in_specs=[
            act_spec(input_dim),            # s
            act_spec(action_dim),           # a
            fixed_spec(w1s.shape),          # W1_s (input_dim, H)
            fixed_spec(w1a.shape),          # W1_a (action_dim, H)
            fixed_spec(b1.shape),           # b1   (1, H)
            fixed_spec(w2.shape),           # W2   (H, H)
            fixed_spec(b2.shape),           # b2   (1, H)
            fixed_spec(w3.shape),           # W3   (1, H) row
            fixed_spec(b3.shape),           # b3   (1, 1)
        ],
        out_specs=pl.BlockSpec((tb, 1), lambda i: (i, 0)),
        compiler_params=pltpu.CompilerParams(
            dimension_semantics=("parallel",)),
        cost_estimate=pl.CostEstimate(
            flops=flops, transcendentals=0, bytes_accessed=bytes_accessed),
    )(s, a, w1s, w1a, b1, w2, b2, w3, b3)

    return out[:B]


def init_critic_params(key, input_dim, hidden_size, action_dim,
                       *, param_dtype=jnp.bfloat16):
    """Matches initialization_fc: weight, bias ~ U(-1/sqrt(fan_in), 1/sqrt(fan_in)).
    Weights stored (in, out); W1 split into state/action halves; q_value weight
    stored as a (1, H) row; biases kept in f32."""
    def linear(k, fan_in, fan_out):
        kw, kb = jax.random.split(k)
        bound = 1.0 / sqrt(fan_in)
        w = jax.random.uniform(kw, (fan_in, fan_out), jnp.float32, -bound, bound)
        b = jax.random.uniform(kb, (1, fan_out), jnp.float32, -bound, bound)
        return w, b

    k1, k2, k3 = jax.random.split(key, 3)
    w1, b1 = linear(k1, input_dim + action_dim, hidden_size)
    w2, b2 = linear(k2, hidden_size, hidden_size)
    w3c, b3 = linear(k3, hidden_size, 1)

    w1s = w1[:input_dim].astype(param_dtype)
    w1a = w1[input_dim:].astype(param_dtype)
    w2 = w2.astype(param_dtype)
    w3 = w3c.T.astype(param_dtype)        # (1, H) row for the VPU reduction
    return (w1s, w1a, b1, w2, b2, w3, b3)


def critic_reference_matched(s, a, params):
    """Pure-JAX reference with the same dtype pipeline as the kernel."""
    w1s, w1a, b1, w2, b2, w3, b3 = params
    wdt = w1s.dtype
    h1 = (jnp.dot(s.astype(wdt), w1s, preferred_element_type=jnp.float32)
          + jnp.dot(a.astype(wdt), w1a, preferred_element_type=jnp.float32) + b1)
    h1 = jnp.maximum(h1, 0.0)
    h2 = jnp.dot(h1.astype(wdt), w2, preferred_element_type=jnp.float32) + b2
    h2 = jnp.maximum(h2, 0.0)
    return jnp.sum(h2 * w3.astype(jnp.float32), axis=-1, keepdims=True) + b3


def critic_reference_f32(s, a, params):
    """Full-f32 (torch-semantics) reference."""
    w1s, w1a, b1, w2, b2, w3, b3 = params
    x = jnp.concatenate([s, a], axis=1)
    w1 = jnp.concatenate([w1s, w1a], axis=0).astype(jnp.float32)
    h1 = jnp.maximum(x @ w1 + b1, 0.0)
    h2 = jnp.maximum(h1 @ w2.astype(jnp.float32) + b2, 0.0)
    return h2 @ w3.astype(jnp.float32).T + b3


if __name__ == "__main__":
    # Small shapes consistent with the module's forward.
    batch, input_dim, action_dim, hidden_size = 2, 16, 4, 32

    key = jax.random.PRNGKey(0)
    ks, ka, kp = jax.random.split(key, 3)
    s = jax.random.normal(ks, (batch, input_dim), jnp.float32)
    a = jax.random.normal(ka, (batch, action_dim), jnp.float32)
    params = init_critic_params(kp, input_dim, hidden_size, action_dim)

    q = critic_forward(s, a, params)
    q = jax.block_until_ready(q)
    assert q.shape == (batch, 1)

    # Tight check vs dtype-matched reference.
    q_ref = critic_reference_matched(s, a, params)
    assert jnp.allclose(q, q_ref, atol=1e-3, rtol=1e-3), (q, q_ref)

    # Loose check vs full-f32 torch-semantics reference (bf16 weight storage).
    q_f32 = critic_reference_f32(s, a, params)
    assert jnp.allclose(q, q_f32, atol=5e-2, rtol=5e-2), (q, q_f32)

    print("KERNEL_OK")
</pallas_src>

<mosaic_0001>
module attributes {stable_mosaic.version = 11 : i64} {
  func.func @critic_kernel(%arg0: i32, %arg1: memref<8x16xf32, #tpu.memory_space<vmem>>, %arg2: memref<8x4xf32, #tpu.memory_space<vmem>>, %arg3: memref<16x32xbf16, #tpu.memory_space<vmem>>, %arg4: memref<4x32xbf16, #tpu.memory_space<vmem>>, %arg5: memref<1x32xf32, #tpu.memory_space<vmem>>, %arg6: memref<32x32xbf16, #tpu.memory_space<vmem>>, %arg7: memref<1x32xf32, #tpu.memory_space<vmem>>, %arg8: memref<1x32xbf16, #tpu.memory_space<vmem>>, %arg9: memref<1x1xf32, #tpu.memory_space<vmem>>, %arg10: memref<8x1xf32, #tpu.memory_space<vmem>>) attributes {dimension_semantics = [#tpu.dimension_semantics<parallel>], iteration_bounds = array<i64: 1>, scalar_prefetch = 0 : i64, scratch_operands = 0 : i64, tpu.core_type = #tpu.core_type<tc>, window_params = [{transform_indices = @transform_0, window_bounds = array<i64: 8, 16>}, {transform_indices = @transform_1, window_bounds = array<i64: 8, 4>}, {pipeline_mode = #tpu.pipeline_mode<synchronous>, transform_indices = @transform_2, window_bounds = array<i64: 16, 32>}, {pipeline_mode = #tpu.pipeline_mode<synchronous>, transform_indices = @transform_3, window_bounds = array<i64: 4, 32>}, {pipeline_mode = #tpu.pipeline_mode<synchronous>, transform_indices = @transform_4, window_bounds = array<i64: 1, 32>}, {pipeline_mode = #tpu.pipeline_mode<synchronous>, transform_indices = @transform_5, window_bounds = array<i64: 32, 32>}, {pipeline_mode = #tpu.pipeline_mode<synchronous>, transform_indices = @transform_6, window_bounds = array<i64: 1, 32>}, {pipeline_mode = #tpu.pipeline_mode<synchronous>, transform_indices = @transform_7, window_bounds = array<i64: 1, 32>}, {pipeline_mode = #tpu.pipeline_mode<synchronous>, transform_indices = @transform_8, window_bounds = array<i64: 1, 1>}, {transform_indices = @transform_9, window_bounds = array<i64: 8, 1>}]} {
    %c0 = arith.constant 0 : index
    %c0_0 = arith.constant 0 : index
    %0 = vector.load %arg1[%c0, %c0_0] : memref<8x16xf32, #tpu.memory_space<vmem>>, vector<8x16xf32>
    %1 = arith.truncf %0 : vector<8x16xf32> to vector<8x16xbf16>
    %c0_1 = arith.constant 0 : index
    %c0_2 = arith.constant 0 : index
    %2 = vector.load %arg3[%c0_1, %c0_2] : memref<16x32xbf16, #tpu.memory_space<vmem>>, vector<16x32xbf16>
    %cst = arith.constant dense<0.000000e+00> : vector<8x32xf32>
    %3 = tpu.matmul %1, %2, %cst {dimension_numbers = #tpu.dot_dimension_numbers<[1], [0], [0], [1], [0, 0, 1, 1], [], []>} : vector<8x16xbf16>, vector<16x32xbf16>, vector<8x32xf32> -> vector<8x32xf32>
    %c0_3 = arith.constant 0 : index
    %c0_4 = arith.constant 0 : index
    %4 = vector.load %arg2[%c0_3, %c0_4] : memref<8x4xf32, #tpu.memory_space<vmem>>, vector<8x4xf32>
    %5 = arith.truncf %4 : vector<8x4xf32> to vector<8x4xbf16>
    %c0_5 = arith.constant 0 : index
    %c0_6 = arith.constant 0 : index
    %6 = vector.load %arg4[%c0_5, %c0_6] : memref<4x32xbf16, #tpu.memory_space<vmem>>, vector<4x32xbf16>
    %cst_7 = arith.constant dense<0.000000e+00> : vector<8x32xf32>
    %7 = tpu.matmul %5, %6, %cst_7 {dimension_numbers = #tpu.dot_dimension_numbers<[1], [0], [0], [1], [0, 0, 1, 1], [], []>} : vector<8x4xbf16>, vector<4x32xbf16>, vector<8x32xf32> -> vector<8x32xf32>
    %8 = arith.addf %3, %7 : vector<8x32xf32>
    %c0_8 = arith.constant 0 : index
    %c0_9 = arith.constant 0 : index
    %9 = vector.load %arg5[%c0_8, %c0_9] : memref<1x32xf32, #tpu.memory_space<vmem>>, vector<1x32xf32>
    %10 = vector.broadcast %9 : vector<1x32xf32> to vector<8x32xf32>
    %11 = arith.addf %8, %10 : vector<8x32xf32>
    %cst_10 = arith.constant 0.000000e+00 : f32
    %12 = vector.broadcast %cst_10 : f32 to vector<8x32xf32>
    %13 = arith.maximumf %11, %12 : vector<8x32xf32>
    %14 = arith.truncf %13 : vector<8x32xf32> to vector<8x32xbf16>
    %c0_11 = arith.constant 0 : index
    %c0_12 = arith.constant 0 : index
    %15 = vector.load %arg6[%c0_11, %c0_12] : memref<32x32xbf16, #tpu.memory_space<vmem>>, vector<32x32xbf16>
    %cst_13 = arith.constant dense<0.000000e+00> : vector<8x32xf32>
    %16 = tpu.matmul %14, %15, %cst_13 {dimension_numbers = #tpu.dot_dimension_numbers<[1], [0], [0], [1], [0, 0, 1, 1], [], []>} : vector<8x32xbf16>, vector<32x32xbf16>, vector<8x32xf32> -> vector<8x32xf32>
    %c0_14 = arith.constant 0 : index
    %c0_15 = arith.constant 0 : index
    %17 = vector.load %arg7[%c0_14, %c0_15] : memref<1x32xf32, #tpu.memory_space<vmem>>, vector<1x32xf32>
    %18 = vector.broadcast %17 : vector<1x32xf32> to vector<8x32xf32>
    %19 = arith.addf %16, %18 : vector<8x32xf32>
    %cst_16 = arith.constant 0.000000e+00 : f32
    %20 = vector.broadcast %cst_16 : f32 to vector<8x32xf32>
    %21 = arith.maximumf %19, %20 : vector<8x32xf32>
    %c0_17 = arith.constant 0 : index
    %c0_18 = arith.constant 0 : index
    %22 = vector.load %arg8[%c0_17, %c0_18] : memref<1x32xbf16, #tpu.memory_space<vmem>>, vector<1x32xbf16>
    %23 = arith.extf %22 : vector<1x32xbf16> to vector<1x32xf32>
    %24 = vector.broadcast %23 : vector<1x32xf32> to vector<8x32xf32>
    %25 = arith.mulf %21, %24 : vector<8x32xf32>
    %cst_19 = arith.constant dense<0.000000e+00> : vector<8xf32>
    %26 = vector.multi_reduction <add>, %25, %cst_19 [1] : vector<8x32xf32> to vector<8xf32>
    %27 = vector.shape_cast %26 : vector<8xf32> to vector<8x1xf32>
    %c0_20 = arith.constant 0 : index
    %c0_21 = arith.constant 0 : index
    %28 = vector.load %arg9[%c0_20, %c0_21] : memref<1x1xf32, #tpu.memory_space<vmem>>, vector<1x1xf32>
    %29 = vector.broadcast %28 : vector<1x1xf32> to vector<8x1xf32>
    %30 = arith.addf %27, %29 : vector<8x1xf32>
    %c0_22 = arith.constant 0 : index
    %c0_23 = arith.constant 0 : index
    %31 = vector.load %arg10[%c0_22, %c0_23] : memref<8x1xf32, #tpu.memory_space<vmem>>, vector<8x1xf32>
    tpu.vector_store %arg10[%c0_22, %c0_23], %30 {strides = array<i32>} : memref<8x1xf32, #tpu.memory_space<vmem>>, vector<8x1xf32>,
    return
  }
  func.func @transform_0(%arg0: i32) -> (i32, i32) {
    %c0_i32 = arith.constant 0 : i32
    %c0_i32_0 = arith.constant 0 : i32
    return %arg0, %c0_i32 : i32, i32
  }
  func.func @transform_1(%arg0: i32) -> (i32, i32) {
    %c0_i32 = arith.constant 0 : i32
    %c0_i32_0 = arith.constant 0 : i32
    return %arg0, %c0_i32 : i32, i32
  }
  func.func @transform_2(%arg0: i32) -> (i32, i32) {
    %c0_i32 = arith.constant 0 : i32
    %c0_i32_0 = arith.constant 0 : i32
    %c0_i32_1 = arith.constant 0 : i32
    return %c0_i32, %c0_i32_0 : i32, i32
  }
  func.func @transform_3(%arg0: i32) -> (i32, i32) {
    %c0_i32 = arith.constant 0 : i32
    %c0_i32_0 = arith.constant 0 : i32
    %c0_i32_1 = arith.constant 0 : i32
    return %c0_i32, %c0_i32_0 : i32, i32
  }
  func.func @transform_4(%arg0: i32) -> (i32, i32) {
    %c0_i32 = arith.constant 0 : i32
    %c0_i32_0 = arith.constant 0 : i32
    %c0_i32_1 = arith.constant 0 : i32
    return %c0_i32, %c0_i32_0 : i32, i32
  }
  func.func @transform_5(%arg0: i32) -> (i32, i32) {
    %c0_i32 = arith.constant 0 : i32
    %c0_i32_0 = arith.constant 0 : i32
    %c0_i32_1 = arith.constant 0 : i32
    return %c0_i32, %c0_i32_0 : i32, i32
  }
  func.func @transform_6(%arg0: i32) -> (i32, i32) {
    %c0_i32 = arith.constant 0 : i32
    %c0_i32_0 = arith.constant 0 : i32
    %c0_i32_1 = arith.constant 0 : i32
    return %c0_i32, %c0_i32_0 : i32, i32
  }
  func.func @transform_7(%arg0: i32) -> (i32, i32) {
    %c0_i32 = arith.constant 0 : i32
    %c0_i32_0 = arith.constant 0 : i32
    %c0_i32_1 = arith.constant 0 : i32
    return %c0_i32, %c0_i32_0 : i32, i32
  }
  func.func @transform_8(%arg0: i32) -> (i32, i32) {
    %c0_i32 = arith.constant 0 : i32
    %c0_i32_0 = arith.constant 0 : i32
    %c0_i32_1 = arith.constant 0 : i32
    return %c0_i32, %c0_i32_0 : i32, i32
  }
  func.func @transform_9(%arg0: i32) -> (i32, i32) {
    %c0_i32 = arith.constant 0 : i32
    %c0_i32_0 = arith.constant 0 : i32
    return %arg0, %c0_i32 : i32, i32
  }
}

</mosaic_0001>

<bundles_post_ra>
// kernel: tpu_custom_call.1
= control target key start
LH: loop header
LB: loop body
LE: loop exit
PB: predicated region body
PF: predicated region fallthrough
CT: control target
= control target key end

     0   :  { %s453_s0 = inlined_call_operand.hbm [shape: f32[8,16], index: 0, kind: input, shape index: {}]   ;;  %s454_s1 = inlined_call_operand.vmem [shape: f32[8,4], index: 1, kind: input, shape index: {}]   ;;  %s455_s2 = inlined_call_operand.hbm [shape: bf16[16,32], index: 2, kind: input, shape index: {}]   ;;  %s456_s3 = inlined_call_operand.vmem [shape: bf16[4,32], index: 3, kind: input, shape index: {}]   ;;  %s457_s4 = inlined_call_operand.vmem [shape: f32[1,32], index: 4, kind: input, shape index: {}]   ;;  %s458_s5 = inlined_call_operand.vmem [shape: bf16[32,32], index: 5, kind: input, shape index: {}]   ;;  %s459_s6 = inlined_call_operand.vmem [shape: f32[1,32], index: 6, kind: input, shape index: {}]   ;;  %s460_s7 = inlined_call_operand.vmem [shape: bf16[1,32], index: 7, kind: input, shape index: {}]   ;;  %s461_s8 = inlined_call_operand.<no memory space> [shape: f32[1,1], index: 8, kind: input, shape index: {}]   ;;  %s462_s9 = inlined_call_operand.vmem [shape: f32[8,1], index: 9, kind: output, shape index: {}]  }
   0x1   :  { %v14_v0 = vstv %s461_s8 }
   0x2   :  { %15 = vst [vmem:[#allocation2] sm:$0x1] %v14_v0 }
   0x3   :  { %16 = vsyncpa [#allocation4], 0 }
   0x4   :  { %17 = vsyncpa [#allocation6], 0  ;;  %s359_s11 = smov [#allocation3]   ;;  %s360_s13 = smov [#allocation5]  }
   0x5   :  { %s24_s12 = sshll.u32 %s359_s11, 4  ;;  %s35_s14 = sshll.u32 %s360_s13, 4  ;;  %s25_s12 = int_to_ptr.vmem [resolvable:$true] %s24_s12  ;;  %s36_s14 = int_to_ptr.vmem [resolvable:$true] %s35_s14 }
   0x6   :  { %s323_s15 = scalar_lea.vmem %s25_s12, 128  ;;  %p328_p1 = scmp.lt.s32.totalorder %s25_s12, %s25_s12 }
   0x7   :  { %p324_p0 = scmp.ne.s32.totalorder %s25_s12, %s323_s15  ;;  %p329_p2 = scmp.lt.s32.totalorder %s323_s15, %s323_s15 }
   0x9   :  { %p330_p3 = por %p329_p2, %p328_p1 }
   0xb   :  { %p331_p4 = pnand %p330_p3, %p324_p0 }
   0xd   :  { %334 = shalt.err (!%p331_p4)
}
   0xe   :  { %27 = dma.hbm_to_vmem [thread:$0]  %s453_s0, 128, %s25_s12, [#allocation4]  }
   0xf   :  { %s343_s8 = scalar_lea.vmem %s36_s14, 128  ;;  %p348_p6 = scmp.lt.s32.totalorder %s36_s14, %s36_s14 }
  0x10   :  { %p344_p5 = scmp.ne.s32.totalorder %s36_s14, %s343_s8  ;;  %p349_p7 = scmp.lt.s32.totalorder %s343_s8, %s343_s8 }
  0x12   :  { %p350_p8 = por %p349_p7, %p348_p6 }
  0x14   :  { %p351_p9 = pnand %p350_p8, %p344_p5 }
  0x16   :  { %354 = shalt.err (!%p351_p9)
}
  0x17   :  { %s361_s18 = smov 64   ;;  %s362_s19 = smov 4  }
  0x18   :  { %41 = dma.hbm_to_vmem [thread:$0]  %s455_s2, 128, %s36_s14, [#allocation6], %s361_s18, %s361_s18, %s362_s19  }
  0x19   :  { %355 = dma.done.wait [#allocation4], 128  }
  0x1a   :  { %356 = vsyncadd [#allocation4], 4294967168 }
  0x1b   :  { %357 = dma.done.wait [#allocation6], 128  }
  0x1c   :  { %358 = vsyncadd [#allocation6], 4294967168  ;;  %v363_v1 = vmov 0.0   ;;  %vm364_vm0 = vmmov 0   ;;  %vm72_vm1 = vcmask 1041408   ;;  %v312_v4 = vld [vmem:[#allocation5] sm:$0xff]   ;;  %v246_v24 = vlaneseq }
  0x1d   :  { %286 = vmatprep.subr.bf16.mxu0 %v363_v1  ;;  %292 = vmatprep.subr.bf16.mxu1 %v363_v1  ;;  %v67_v2 = vld [vmem:[%s456_s3] sm:$0x3]  ;;  %vm68_vm2 = vcmask 31744   ;;  %vm122_vm3 = vcmask 130048   ;;  %v313_v9 = vld [vmem:[%s458_s5 + $0x8] sm:$0xff]   ;;  %vm199_vm4 = vcmask 261120  }
  0x1e   :  { %288 = vmatprep.mubr.msk.bf16.mxu0 %vm364_vm0, %v363_v1  ;;  %294 = vmatprep.mubr.msk.bf16.mxu1 %vm364_vm0, %v363_v1  ;;  %v74_v3 = vsel %vm72_vm1, %v67_v2, 0  ;;  %v65_v5 = vld [vmem:[%s454_s1] sm:$0xff]  ;;  %v247_v25 = vshrl.u32 %v246_v24, 7  ;;  %vm262_vm5 = vcmask 7168  }
  0x1f   :  { %v61_v6 = vld [vmem:[#allocation3] sm:$0xff]  ;;  %287 = vmatpush3.bf16.msra.mxu0 %v74_v3  ;;  %v66_v7 = vpack.c.bf16 %v65_v5, %v65_v5  ;;  %293 = vmatpush3.bf16.msra.mxu1 %v312_v4  ;;  %v273_v13 = vld [vmem:[%s457_s4] ss:$0 sm:$0xff] }
  0x20   :  { %v62_v8 = vpack.c.bf16 %v61_v6, %v61_v6  ;;  %298 = vmatprep.subr.bf16.mxu0 %v363_v1  ;;  %v314_v10 = vld [vmem:[%s458_s5] sm:$0xff]   ;;  %v248_v28 = vsub.s32 0, %v247_v25 }
  0x21   :  { %v244_v26 = vld [vmem:[%s460_s7] sm:$0x1] }
  0x22   :  { %289 = vmatmul.mubr.msk.bf16.vlgmr.msra.gmra.mxu0 %vm68_vm2, %v66_v7  ;;  %295 = vmatmul.mubr.msk.bf16.vlgmr.msra.gmra.mxu1 %vm122_vm3, %v62_v8  ;;  %v245_v27 = vunpack.c.l.bf16 %v244_v26  ;;  %v274_v29 = vld [vmem:[%s459_s6] ss:$0 sm:$0xff] }
  0x23   :  { %302 = vmatprep.mubr.msk.bf16.mxu0 %vm364_vm0, %v363_v1  ;;  %299 = vmatpush3.bf16.msra.mxu0 %v313_v9  ;;  %v278_v39 = vld [vmem:[#allocation2] ss:$0 sm:$0xff] }
  0x24   :  { %300 = vmatprep.subr.bf16.mxu0 %v363_v1  ;;  %v249_v32 = vrot.slane %v245_v27, %v248_v28 }
  0x27   :  { %301 = vmatpush3.bf16.msra.mxu0 %v314_v10 }
  0xe2   :  { %v110_v11 = vpop.f32.mrf.mxu0  ;;  %v160_v12 = vpop.f32.mrf.mxu1 }
  0xe3   :  { %v161_v14 = vadd.f32 %v160_v12, %v110_v11 }
  0xe4   :  { %v290_v15 = vpop.f32.mrf.mxu0  ;;  %v296_v16 = vpop.f32.mrf.mxu1 }
  0xe5   :  { %v173_v17 = vadd.f32 %v273_v13, %v161_v14 }
  0xe6   :  { %v113_v18 = vpop.f32.mrf.mxu0  ;;  %v163_v19 = vpop.f32.mrf.mxu1 }
  0xe7   :  { %v174_v20 = vmax.f32 %v173_v17, 0.0 }
  0xe8   :  { %v291_v21 = vpop.f32.mrf.mxu0  ;;  %v297_v22 = vpop.f32.mrf.mxu1 }
  0xe9   :  { %v175_v23 = vpack.c.bf16 %v174_v20, %v174_v20 }
  0xeb   :  { %303 = vmatmul.mubr.msk.bf16.vlgmr.msra.gmra.mxu0 %vm199_vm4, %v175_v23 }
 0x1ab   :  { %v237_v30 = vpop.f32.mrf.mxu0 }
 0x1ac   :  { %v238_v31 = vadd.f32 %v274_v29, %v237_v30 }
 0x1ad   :  { %v304_v33 = vpop.f32.mrf.mxu0 }
 0x1ae   :  { %v243_v34 = vmax.f32 %v238_v31, 0.0 }
 0x1af   :  { %v240_v35 = vpop.f32.mrf.mxu0 }
 0x1b0   :  { %v250_v36 = vmul.f32 %v249_v32, %v243_v34 }
 0x1b1   :  { %v305_v37 = vpop.f32.mrf.mxu0 }
 0x1b2   :  { %v251_v38 = vsel %vm199_vm4, %v250_v36, 0.0 }
 0x1b3   :  { %252 = vadd.xlane.f32.xlu0 %v251_v38 }
 0x23c   :  { %v253_v40 = vpop.xlane.xlu0 %252 }
 0x23d   :  { %v261_v41 = vadd.f32 %v278_v39, %v253_v40 }
 0x23f   :  { %263 = vst.msk [vmem:[%s462_s9] sm:$0xff] %vm262_vm5, %v261_v41 }
 0x240   :  { %268 = vsyncpa [#allocation4], 1 }
 0x241   :  { %269 = vsyncpa [#allocation6], 1 }

</bundles_post_ra>
